<compile_context>
chip_gen: v5e
topology: v5e:2x2
jax: 0.10.0
libtpu: 0.0.40
codegen_flags: <defaults>
</compile_context>

<pallas_src>
import functools

import jax
import jax.numpy as jnp
from jax import lax
from jax.experimental import pallas as pl
from jax.experimental.pallas import tpu as pltpu


def _feedy_kernel(x_ref,
                  w1_ref, b1_ref,
                  w2_ref, b2_ref,
                  w3_ref, b3_ref,
                  w4_ref, b4_ref,
                  o_ref):
    """Fused 4-layer MLP forward for one batch tile, computed transposed.

    x_ref : (bt, p)     batch tile as stored in HBM (batch on sublanes)
    wN_ref: (out, in)   PyTorch orientation
    bN_ref: (out, 1)    broadcast along lanes (batch)
    o_ref : (1, bt)     lane-dense output row
    """
    x = x_ref[...]

    # fc1: contract the feature axis of both operands -> (36, bt), batch on lanes.
    h = lax.dot_general(
        w1_ref[...], x,
        dimension_numbers=(((1,), (1,)), ((), ())),
        preferred_element_type=jnp.float32)
    h = jnp.maximum(h + b1_ref[...], 0.0)

    # fc2: (12, 36) @ (36, bt) -> (12, bt)
    h = jnp.dot(w2_ref[...], h, preferred_element_type=jnp.float32)
    h = jnp.maximum(h + b2_ref[...], 0.0)

    # fc3: (6, 12) @ (12, bt) -> (6, bt)
    h = jnp.dot(w3_ref[...], h, preferred_element_type=jnp.float32)
    h = jnp.maximum(h + b3_ref[...], 0.0)

    # fc4: (1, 6) @ (6, bt) -> (1, bt)   (no activation)
    h = jnp.dot(w4_ref[...], h, preferred_element_type=jnp.float32)
    h = h + b4_ref[...]

    o_ref[...] = h.astype(o_ref.dtype)


def _round_up(v, m):
    return ((v + m - 1) // m) * m


@functools.partial(jax.jit, static_argnames=("batch_tile",))
def feedy_forward(x, params, *, batch_tile=1024):
    """x: (N, p). params: PyTorch-oriented weights (out,in) and biases (out,1).

    Returns (N, 1), matching the PyTorch module's forward.
    """
    assert batch_tile % 8 == 0, "batch_tile must be a multiple of 8"
    n, p = x.shape
    w1, b1 = params["w1"], params["b1"]
    w2, b2 = params["w2"], params["b2"]
    w3, b3 = params["w3"], params["b3"]
    w4, b4 = params["w4"], params["b4"]

    # Large tiles amortize per-step overhead; shrink for small N so the block
    # never wildly exceeds the array (last block may still overhang by < 8 rows,
    # which Pallas masks; the garbage tail lanes are sliced off below).
    bt = min(batch_tile, _round_up(n, 8))
    num_tiles = pl.cdiv(n, bt)
    padded_n = num_tiles * bt

    def full(a):
        nd = a.ndim
        return pl.BlockSpec(a.shape, lambda i, _nd=nd: (0,) * _nd)

    out_row = pl.pallas_call(
        _feedy_kernel,
        # Lane-dense output: one (1, bt) row per grid step.
        out_shape=jax.ShapeDtypeStruct((1, padded_n), x.dtype),
        grid_spec=pltpu.PrefetchScalarGridSpec(
            num_scalar_prefetch=0,
            grid=(num_tiles,),
            in_specs=[
                pl.BlockSpec((bt, p), lambda i: (i, 0)),
                full(w1), full(b1),
                full(w2), full(b2),
                full(w3), full(b3),
                full(w4), full(b4),
            ],
            out_specs=pl.BlockSpec((1, bt), lambda i: (0, i)),
        ),
        compiler_params=pltpu.CompilerParams(
            dimension_semantics=("parallel",)),
    )(x, w1, b1, w2, b2, w3, b3, w4, b4)

    # Drop padded tail lanes and restore the (N, 1) PyTorch output shape.
    return out_row[0, :n].reshape(n, 1)


def init_feedy_params(key, num_features):
    """Deterministic init mimicking nn.Linear's U(-1/sqrt(fan_in), 1/sqrt(fan_in)).

    Weights are stored in PyTorch orientation (out_features, in_features);
    biases as (out_features, 1) so they broadcast along the lane (batch) axis.
    """
    dims = [(num_features, 36), (36, 12), (12, 6), (6, 1)]
    params = {}
    for idx, (fan_in, fan_out) in enumerate(dims, start=1):
        key, kw, kb = jax.random.split(key, 3)
        bound = 1.0 / jnp.sqrt(jnp.float32(fan_in))
        params[f"w{idx}"] = jax.random.uniform(
            kw, (fan_out, fan_in), jnp.float32, -bound, bound)
        params[f"b{idx}"] = jax.random.uniform(
            kb, (fan_out, 1), jnp.float32, -bound, bound)
    return params


def feedy_reference(x, params):
    """Plain-JAX reference (high-precision matmuls) for correctness checking."""
    hp = jax.lax.Precision.HIGHEST
    h = jnp.maximum(jnp.dot(x, params["w1"].T, precision=hp) + params["b1"].T, 0.0)
    h = jnp.maximum(jnp.dot(h, params["w2"].T, precision=hp) + params["b2"].T, 0.0)
    h = jnp.maximum(jnp.dot(h, params["w3"].T, precision=hp) + params["b3"].T, 0.0)
    return jnp.dot(h, params["w4"].T, precision=hp) + params["b4"].T


if __name__ == "__main__":
    key = jax.random.PRNGKey(0)
    num_features = 32
    kp, kx1, kx2 = jax.random.split(key, 3)
    params = init_feedy_params(kp, num_features)

    # Small case: single (partial) tile.
    x_small = jax.random.normal(kx1, (16, num_features), jnp.float32)
    out_small = jax.block_until_ready(feedy_forward(x_small, params))
    ref_small = feedy_reference(x_small, params)
    assert out_small.shape == (16, 1), out_small.shape
    assert jnp.allclose(out_small, ref_small, atol=1e-4, rtol=1e-4), \
        f"max abs err = {jnp.max(jnp.abs(out_small - ref_small))}"

    # Multi-tile case with a ragged tail: exercises the lane-dense tiled path.
    x_big = jax.random.normal(kx2, (2100, num_features), jnp.float32)
    out_big = jax.block_until_ready(feedy_forward(x_big, params))
    ref_big = feedy_reference(x_big, params)
    assert out_big.shape == (2100, 1), out_big.shape
    assert jnp.allclose(out_big, ref_big, atol=1e-4, rtol=1e-4), \
        f"max abs err = {jnp.max(jnp.abs(out_big - ref_big))}"

    print("KERNEL_OK")
</pallas_src>

<mosaic_0001>
module attributes {stable_mosaic.version = 11 : i64} {
  func.func @_feedy_kernel(%arg0: i32, %arg1: memref<16x32xf32, #tpu.memory_space<vmem>>, %arg2: memref<36x32xf32, #tpu.memory_space<vmem>>, %arg3: memref<36x1xf32, #tpu.memory_space<vmem>>, %arg4: memref<12x36xf32, #tpu.memory_space<vmem>>, %arg5: memref<12x1xf32, #tpu.memory_space<vmem>>, %arg6: memref<6x12xf32, #tpu.memory_space<vmem>>, %arg7: memref<6x1xf32, #tpu.memory_space<vmem>>, %arg8: memref<1x6xf32, #tpu.memory_space<vmem>>, %arg9: memref<1x1xf32, #tpu.memory_space<vmem>>, %arg10: memref<1x16xf32, #tpu.memory_space<vmem>>) attributes {dimension_semantics = [#tpu.dimension_semantics<parallel>], iteration_bounds = array<i64: 1>, scalar_prefetch = 0 : i64, scratch_operands = 0 : i64, tpu.core_type = #tpu.core_type<tc>, window_params = [{transform_indices = @transform_0, window_bounds = array<i64: 16, 32>}, {pipeline_mode = #tpu.pipeline_mode<synchronous>, transform_indices = @transform_1, window_bounds = array<i64: 36, 32>}, {pipeline_mode = #tpu.pipeline_mode<synchronous>, transform_indices = @transform_2, window_bounds = array<i64: 36, 1>}, {pipeline_mode = #tpu.pipeline_mode<synchronous>, transform_indices = @transform_3, window_bounds = array<i64: 12, 36>}, {pipeline_mode = #tpu.pipeline_mode<synchronous>, transform_indices = @transform_4, window_bounds = array<i64: 12, 1>}, {pipeline_mode = #tpu.pipeline_mode<synchronous>, transform_indices = @transform_5, window_bounds = array<i64: 6, 12>}, {pipeline_mode = #tpu.pipeline_mode<synchronous>, transform_indices = @transform_6, window_bounds = array<i64: 6, 1>}, {pipeline_mode = #tpu.pipeline_mode<synchronous>, transform_indices = @transform_7, window_bounds = array<i64: 1, 6>}, {pipeline_mode = #tpu.pipeline_mode<synchronous>, transform_indices = @transform_8, window_bounds = array<i64: 1, 1>}, {transform_indices = @transform_9, window_bounds = array<i64: 1, 16>}]} {
    %c0 = arith.constant 0 : index
    %c0_0 = arith.constant 0 : index
    %0 = vector.load %arg1[%c0, %c0_0] : memref<16x32xf32, #tpu.memory_space<vmem>>, vector<16x32xf32>
    %c0_1 = arith.constant 0 : index
    %c0_2 = arith.constant 0 : index
    %1 = vector.load %arg2[%c0_1, %c0_2] : memref<36x32xf32, #tpu.memory_space<vmem>>, vector<36x32xf32>
    %cst = arith.constant dense<0.000000e+00> : vector<36x16xf32>
    %2 = tpu.matmul %1, %0, %cst {dimension_numbers = #tpu.dot_dimension_numbers<[1], [1], [0], [0], [0, 0, 1, 0], [], []>} : vector<36x32xf32>, vector<16x32xf32>, vector<36x16xf32> -> vector<36x16xf32>
    %c0_3 = arith.constant 0 : index
    %c0_4 = arith.constant 0 : index
    %3 = vector.load %arg3[%c0_3, %c0_4] : memref<36x1xf32, #tpu.memory_space<vmem>>, vector<36x1xf32>
    %4 = vector.broadcast %3 : vector<36x1xf32> to vector<36x16xf32>
    %5 = arith.addf %2, %4 : vector<36x16xf32>
    %cst_5 = arith.constant 0.000000e+00 : f32
    %6 = vector.broadcast %cst_5 : f32 to vector<36x16xf32>
    %7 = arith.maximumf %5, %6 : vector<36x16xf32>
    %c0_6 = arith.constant 0 : index
    %c0_7 = arith.constant 0 : index
    %8 = vector.load %arg4[%c0_6, %c0_7] : memref<12x36xf32, #tpu.memory_space<vmem>>, vector<12x36xf32>
    %cst_8 = arith.constant dense<0.000000e+00> : vector<12x16xf32>
    %9 = tpu.matmul %8, %7, %cst_8 {dimension_numbers = #tpu.dot_dimension_numbers<[1], [0], [0], [1], [0, 0, 1, 1], [], []>} : vector<12x36xf32>, vector<36x16xf32>, vector<12x16xf32> -> vector<12x16xf32>
    %c0_9 = arith.constant 0 : index
    %c0_10 = arith.constant 0 : index
    %10 = vector.load %arg5[%c0_9, %c0_10] : memref<12x1xf32, #tpu.memory_space<vmem>>, vector<12x1xf32>
    %11 = vector.broadcast %10 : vector<12x1xf32> to vector<12x16xf32>
    %12 = arith.addf %9, %11 : vector<12x16xf32>
    %cst_11 = arith.constant 0.000000e+00 : f32
    %13 = vector.broadcast %cst_11 : f32 to vector<12x16xf32>
    %14 = arith.maximumf %12, %13 : vector<12x16xf32>
    %c0_12 = arith.constant 0 : index
    %c0_13 = arith.constant 0 : index
    %15 = vector.load %arg6[%c0_12, %c0_13] : memref<6x12xf32, #tpu.memory_space<vmem>>, vector<6x12xf32>
    %cst_14 = arith.constant dense<0.000000e+00> : vector<6x16xf32>
    %16 = tpu.matmul %15, %14, %cst_14 {dimension_numbers = #tpu.dot_dimension_numbers<[1], [0], [0], [1], [0, 0, 1, 1], [], []>} : vector<6x12xf32>, vector<12x16xf32>, vector<6x16xf32> -> vector<6x16xf32>
    %c0_15 = arith.constant 0 : index
    %c0_16 = arith.constant 0 : index
    %17 = vector.load %arg7[%c0_15, %c0_16] : memref<6x1xf32, #tpu.memory_space<vmem>>, vector<6x1xf32>
    %18 = vector.broadcast %17 : vector<6x1xf32> to vector<6x16xf32>
    %19 = arith.addf %16, %18 : vector<6x16xf32>
    %cst_17 = arith.constant 0.000000e+00 : f32
    %20 = vector.broadcast %cst_17 : f32 to vector<6x16xf32>
    %21 = arith.maximumf %19, %20 : vector<6x16xf32>
    %c0_18 = arith.constant 0 : index
    %c0_19 = arith.constant 0 : index
    %22 = vector.load %arg8[%c0_18, %c0_19] : memref<1x6xf32, #tpu.memory_space<vmem>>, vector<1x6xf32>
    %cst_20 = arith.constant dense<0.000000e+00> : vector<1x16xf32>
    %23 = tpu.matmul %22, %21, %cst_20 {dimension_numbers = #tpu.dot_dimension_numbers<[1], [0], [0], [1], [0, 0, 1, 1], [], []>} : vector<1x6xf32>, vector<6x16xf32>, vector<1x16xf32> -> vector<1x16xf32>
    %c0_21 = arith.constant 0 : index
    %c0_22 = arith.constant 0 : index
    %24 = vector.load %arg9[%c0_21, %c0_22] : memref<1x1xf32, #tpu.memory_space<vmem>>, vector<1x1xf32>
    %25 = vector.broadcast %24 : vector<1x1xf32> to vector<1x16xf32>
    %26 = arith.addf %23, %25 : vector<1x16xf32>
    %c0_23 = arith.constant 0 : index
    %c0_24 = arith.constant 0 : index
    %27 = vector.load %arg10[%c0_23, %c0_24] : memref<1x16xf32, #tpu.memory_space<vmem>>, vector<1x16xf32>
    tpu.vector_store %arg10[%c0_23, %c0_24], %26 {strides = array<i32>} : memref<1x16xf32, #tpu.memory_space<vmem>>, vector<1x16xf32>,
    return
  }
  func.func @transform_0(%arg0: i32) -> (i32, i32) {
    %c0_i32 = arith.constant 0 : i32
    %c0_i32_0 = arith.constant 0 : i32
    return %arg0, %c0_i32 : i32, i32
  }
  func.func @transform_1(%arg0: i32) -> (i32, i32) {
    %c0_i32 = arith.constant 0 : i32
    %c0_i32_0 = arith.constant 0 : i32
    %c0_i32_1 = arith.constant 0 : i32
    return %c0_i32, %c0_i32_0 : i32, i32
  }
  func.func @transform_2(%arg0: i32) -> (i32, i32) {
    %c0_i32 = arith.constant 0 : i32
    %c0_i32_0 = arith.constant 0 : i32
    %c0_i32_1 = arith.constant 0 : i32
    return %c0_i32, %c0_i32_0 : i32, i32
  }
  func.func @transform_3(%arg0: i32) -> (i32, i32) {
    %c0_i32 = arith.constant 0 : i32
    %c0_i32_0 = arith.constant 0 : i32
    %c0_i32_1 = arith.constant 0 : i32
    return %c0_i32, %c0_i32_0 : i32, i32
  }
  func.func @transform_4(%arg0: i32) -> (i32, i32) {
    %c0_i32 = arith.constant 0 : i32
    %c0_i32_0 = arith.constant 0 : i32
    %c0_i32_1 = arith.constant 0 : i32
    return %c0_i32, %c0_i32_0 : i32, i32
  }
  func.func @transform_5(%arg0: i32) -> (i32, i32) {
    %c0_i32 = arith.constant 0 : i32
    %c0_i32_0 = arith.constant 0 : i32
    %c0_i32_1 = arith.constant 0 : i32
    return %c0_i32, %c0_i32_0 : i32, i32
  }
  func.func @transform_6(%arg0: i32) -> (i32, i32) {
    %c0_i32 = arith.constant 0 : i32
    %c0_i32_0 = arith.constant 0 : i32
    %c0_i32_1 = arith.constant 0 : i32
    return %c0_i32, %c0_i32_0 : i32, i32
  }
  func.func @transform_7(%arg0: i32) -> (i32, i32) {
    %c0_i32 = arith.constant 0 : i32
    %c0_i32_0 = arith.constant 0 : i32
    %c0_i32_1 = arith.constant 0 : i32
    return %c0_i32, %c0_i32_0 : i32, i32
  }
  func.func @transform_8(%arg0: i32) -> (i32, i32) {
    %c0_i32 = arith.constant 0 : i32
    %c0_i32_0 = arith.constant 0 : i32
    %c0_i32_1 = arith.constant 0 : i32
    return %c0_i32, %c0_i32_0 : i32, i32
  }
  func.func @transform_9(%arg0: i32) -> (i32, i32) {
    %c0_i32 = arith.constant 0 : i32
    %c0_i32_0 = arith.constant 0 : i32
    return %c0_i32, %arg0 : i32, i32
  }
}

</mosaic_0001>

<bundles_post_ra>
// kernel: feedy_forward.1
= control target key start
LH: loop header
LB: loop body
LE: loop exit
PB: predicated region body
PF: predicated region fallthrough
CT: control target
= control target key end

     0   :  { %s443_s0 = inlined_call_operand.vmem [shape: f32[16,32], index: 0, kind: input, shape index: {}]   ;;  %s444_s1 = inlined_call_operand.vmem [shape: f32[36,32], index: 1, kind: input, shape index: {}]   ;;  %s445_s2 = inlined_call_operand.vmem [shape: f32[36,1], index: 2, kind: input, shape index: {}]   ;;  %s446_s3 = inlined_call_operand.vmem [shape: f32[12,36], index: 3, kind: input, shape index: {}]   ;;  %s447_s4 = inlined_call_operand.vmem [shape: f32[12,1], index: 4, kind: input, shape index: {}]   ;;  %s448_s5 = inlined_call_operand.vmem [shape: f32[6,12], index: 5, kind: input, shape index: {}]   ;;  %s449_s6 = inlined_call_operand.vmem [shape: f32[6,1], index: 6, kind: input, shape index: {}]   ;;  %s450_s7 = inlined_call_operand.vmem [shape: f32[1,6], index: 7, kind: input, shape index: {}]   ;;  %s451_s8 = inlined_call_operand.<no memory space> [shape: f32[1,1], index: 8, kind: input, shape index: {}]   ;;  %s452_s9 = inlined_call_operand.hbm [shape: f32[1,16], index: 9, kind: output, shape index: {}]  }
   0x1   :  { %v14_v0 = vstv %s451_s8 }
   0x2   :  { %15 = vst [vmem:[#allocation2] sm:$0x1] %v14_v0 }
   0x3   :  { %v36_v1 = vld [vmem:[%s443_s0 + $0x8] sm:$0xff]  ;;  %vm72_vm0 = vcmask 261120   ;;  %v46_v2 = vld [vmem:[%s445_s2 + $0x20] sm:$0xf]  ;;  %v44_v3 = vld [vmem:[%s445_s2 + $0x10] sm:$0xff]  ;;  %v317_v5 = vmov 0  }
   0x4   :  { %270 = vmatpush.xpose.msk.msra.mxu0 %vm72_vm0, %v36_v1  ;;  %284 = vmatpush.xpose.msk.msra.mxu3 %vm72_vm0, %v36_v1  ;;  %v35_v4 = vld [vmem:[%s443_s0] sm:$0xff]  ;;  %v40_v8 = vld [vmem:[%s444_s1 + $0x18] sm:$0xff] }
   0x5   :  { %288 = vset.pattern.permute.xlu0 %v317_v5  ;;  %289 = vset.pattern.permute.xlu1 %v317_v5  ;;  %v42_v6 = vld [vmem:[%s445_s2] sm:$0xff] }
   0x6   :  { %69 = vperm.xlu0 %288, %v46_v2   ;;  %59 = vperm.xlu1 %289, %v44_v3   ;;  %v37_v7 = vld [vmem:[%s444_s1] sm:$0xff] }
   0x7   :  { %290 = vset.pattern.permute.xlu2 %v317_v5 }
   0x8   :  { %271 = vmatpush.xpose.msk.msra.mxu0 %vm72_vm0, %v35_v4  ;;  %285 = vmatpush.xpose.msk.msra.mxu3 %vm72_vm0, %v35_v4 }
   0x9   :  { %16 = vsyncpa [#allocation4], 0  ;;  %49 = vperm.xlu2 %290, %v42_v6   ;;  %v45_v9 = vld [vmem:[%s445_s2 + $0x18] sm:$0xff]  ;;  %v43_v10 = vld [vmem:[%s445_s2 + $0x8] sm:$0xff]  ;;  %vm152_vm1 = vcmask 1043456   ;;  %vm145_vm2 = vcmask 293888  }
   0xa   :  { %v134_v11 = vld [vmem:[%s447_s4 + $0x8] sm:$0xf]  ;;  %v41_v13 = vld [vmem:[%s444_s1 + $0x20] sm:$0xf]  ;;  %v39_v17 = vld [vmem:[%s444_s1 + $0x10] sm:$0xff]  ;;  %vm188_vm3 = vcmask 97280  }
   0xb   :  { %272 = vmatmul.msk.f32.vlgmr.msra.gmra.mxu0 %vm72_vm0, %v37_v7  ;;  %275 = vmatmul.msk.f32.vlgmr.msra.gmra.mxu3 %vm72_vm0, %v40_v8  ;;  %v38_v12 = vld [vmem:[%s444_s1 + $0x8] sm:$0xff]  ;;  %v133_v14 = vld [vmem:[%s447_s4] sm:$0xff]  ;;  %vm228_vm4 = vcmask 1045504   ;;  %vm224_vm5 = vcmask 48128   ;;  %s318_s20 = smov [#allocation3]   ;;  %s261_s0 = sshll.u32 %s452_s9, 4  ;;  %s262_s0 = int_to_ptr.hbm [resolvable:$true] %s261_s0 }
   0xc   :  { %v182_v15 = vld [vmem:[%s449_s6] sm:$0x3f]  ;;  %v132_v39 = vld [vmem:[%s446_s3 + $0x8] sm:$0xf]  ;;  %s259_s21 = sshll.u32 %s318_s20, 4  ;;  %vm252_vm6 = vcmask 122880   ;;  %s260_s21 = int_to_ptr.vmem [resolvable:$true] %s259_s21 }
   0xd   :  { %v217_v16 = vld [vmem:[#allocation2] sm:$0x1] }
   0xe   :  { %64 = vperm.xlu0 %288, %v45_v9   ;;  %54 = vperm.xlu1 %289, %v43_v10   ;;  %v131_v38 = vld [vmem:[%s446_s3] sm:$0xff] }
   0xf   :  { %v181_v48 = vld [vmem:[%s448_s5] sm:$0x3f] }
  0x10   :  { %v216_v53 = vld [vmem:[%s450_s7] sm:$0x1] }
  0x11   :  { %142 = vperm.xlu2 %290, %v134_v11  }
  0x13   :  { %273 = vmatmul.msk.f32.gmra.mxu0 %vm72_vm0, %v38_v12  ;;  %276 = vmatmul.msk.f32.gmra.mxu3 %vm72_vm0, %v41_v13 }
  0x16   :  { %137 = vperm.xlu0 %288, %v133_v14   ;;  %185 = vperm.xlu1 %289, %v182_v15  }
  0x19   :  { %220 = vperm.xlu2 %290, %v217_v16  }
  0x1b   :  { %274 = vmatmul.msk.f32.gmra.mxu0 %vm72_vm0, %v39_v17 }
  0x63   :  { %v50_v30 = vpop.permute.xlu2 %49 }
  0x6b   :  { %v143_v41 = vpop.permute.xlu2 %142 }
  0x73   :  { %v221_v54 = vpop.permute.xlu2 %220 }
  0x74   :  { %v223_v55 = vperm.slane %v221_v54, 0 }
  0x78   :  { %v70_v19 = vpop.permute.xlu0 %69  ;;  %v60_v21 = vpop.permute.xlu1 %59 }
  0x80   :  { %v65_v23 = vpop.permute.xlu0 %64  ;;  %v55_v31 = vpop.permute.xlu1 %54 }
  0x88   :  { %v111_v18 = vpop.f32.mrf.mxu0  ;;  %v138_v42 = vpop.permute.xlu0 %137 }
  0x89   :  { %v112_v34 = vadd.f32 %v111_v18, %v50_v30  ;;  %v186_v49 = vpop.permute.xlu1 %185 }
  0x8b   :  { %v126_v37 = vmax.f32 %v112_v34, 0.0 }
  0x8e   :  { %v120_v20 = vpop.f32.mrf.mxu3 }
  0x8f   :  { %v121_v25 = vadd.f32 %v120_v20, %v65_v23 }
  0x90   :  { %v114_v22 = vpop.f32.mrf.mxu0 }
  0x91   :  { %v129_v32 = vmax.f32 %v121_v25, 0.0  ;;  %v115_v33 = vadd.f32 %v114_v22, %v55_v31 }
  0x93   :  { %v127_v36 = vmax.f32 %v115_v33, 0.0 }
  0x96   :  { %v123_v24 = vpop.f32.mrf.mxu3 }
  0x97   :  { %v124_v26 = vadd.f32 %v123_v24, %v70_v19 }
  0x98   :  { %v117_v27 = vpop.f32.mrf.mxu0 }
  0x99   :  { %v130_v28 = vmax.f32 %v124_v26, 0.0  ;;  %v118_v29 = vadd.f32 %v117_v27, %v60_v21 }
  0x9b   :  { %277 = vmatpush.msk.msra.mxu1 %vm152_vm1, %v130_v28  ;;  %v128_v35 = vmax.f32 %v118_v29, 0.0 }
  0x9d   :  { %168 = vmatpush.msra.mxu1 %v129_v32 }
  0x9f   :  { %169 = vmatpush.msra.mxu1 %v128_v35 }
  0xa1   :  { %170 = vmatpush.msra.mxu1 %v127_v36 }
  0xa3   :  { %171 = vmatpush.msra.mxu1 %v126_v37 }
  0xa4   :  { %278 = vmatmul.msk.f32.vlgmr.msra.gmra.mxu1 %vm145_vm2, %v131_v38 }
  0xac   :  { %279 = vmatmul.msk.f32.gmra.mxu1 %vm145_vm2, %v132_v39 }
 0x121   :  { %v173_v40 = vpop.f32.mrf.mxu1 }
 0x122   :  { %v174_v44 = vadd.f32 %v173_v40, %v138_v42 }
 0x124   :  { %v179_v47 = vmax.f32 %v174_v44, 0.0 }
 0x129   :  { %v176_v43 = vpop.f32.mrf.mxu1 }
 0x12a   :  { %v177_v45 = vadd.f32 %v176_v43, %v143_v41 }
 0x12c   :  { %v180_v46 = vmax.f32 %v177_v45, 0.0 }
 0x12e   :  { %280 = vmatpush.msk.msra.mxu2 %vm152_vm1, %v180_v46 }
 0x130   :  { %210 = vmatpush.msra.mxu2 %v179_v47 }
 0x131   :  { %281 = vmatmul.msk.f32.vlgmr.msra.gmra.mxu2 %vm188_vm3, %v181_v48 }
 0x1b4   :  { %v212_v50 = vpop.f32.mrf.mxu2 }
 0x1b5   :  { %v213_v51 = vadd.f32 %v212_v50, %v186_v49 }
 0x1b7   :  { %v215_v52 = vmax.f32 %v213_v51, 0.0 }
 0x1b9   :  { %282 = vmatpush.msk.msrb.mxu3 %vm228_vm4, %v215_v52 }
 0x1ba   :  { %283 = vmatmul.msk.f32.vlgmr.msrb.gmra.mxu3 %vm224_vm5, %v216_v53 }
 0x23d   :  { %v249_v56 = vpop.f32.mrf.mxu3 }
 0x23e   :  { %v250_v57 = vadd.f32 %v249_v56, %v223_v55 }
 0x240   :  { %253 = vst.msk [vmem:[#allocation3] sm:$0x1] %vm252_vm6, %v250_v57 }
 0x241   :  { %264 = dma.vmem_to_hbm [thread:$0]  %s260_s21, 16, %s262_s0, [#allocation4]  }
 0x242   :  { %315 = dma.done.wait [#allocation4], 16  }
 0x243   :  { %316 = vsyncadd [#allocation4], 4294967280 }
 0x244   :  { %269 = vsyncpa [#allocation4], 1 }

</bundles_post_ra>
